<compile_context>
chip_gen: v6e
topology: v6e:2x2x1
jax: 0.10.0
libtpu: 0.0.40
codegen_flags: <defaults>
</compile_context>

<pallas_src>
import jax
import jax.numpy as jnp
from jax.experimental import pallas as pl
from jax.experimental.pallas import tpu as pltpu

# ------------------------- model configuration (small) ----------------------
B = 8                 # batch
S = 8                 # sequence length
H_BERT = 256          # surrogate "bert.config.hidden_size"
HIDDEN = 128          # hidden_size of the classifier heads
SENT_CLASSES = 2
DOM_CLASSES = 2
CLS_PAD = 128         # fused logit lane width (one full vreg lane width)
DOM_OFF = SENT_CLASSES            # domain logits live at lanes 2:4 (contiguous slab)
VOCAB = 64
TYPE_VOCAB = 2
H2 = 2 * HIDDEN                   # fused first-layer width (= 256)
BIAS_W = H_BERT + H2 + CLS_PAD    # packed bias lanes (= 640)
SUBLANE_PACK = 16                 # bf16 sublane packing: pad M to a multiple of 16


# ------------------------------- Pallas kernel -------------------------------
def sdm_kernel(emb_ref, wrow_ref, wp_ref, w1_ref, w2_ref, bias_ref, out_ref):
    # --- attention-masked mean (weights already contain 1/denom) -------------
    emb = emb_ref[...].astype(jnp.float32)                # (M, S, H)
    w = wrow_ref[...]                                     # (M, S) f32
    feats = jnp.sum(emb * w[:, :, None], axis=1)          # (M, H) f32

    # Packed biases (f32): [b_pool(256) | b1_fused(256) | b2_fused(128)]
    b_pool = bias_ref[:, 0:H_BERT]                        # (1, 256)
    b1 = bias_ref[:, H_BERT:H_BERT + H2]                  # (1, 256)
    b2 = bias_ref[:, H_BERT + H2:BIAS_W]                  # (1, 128)

    # --- BERT pooler surrogate: tanh(W_p x + b_p) -----------------------------
    pooled = jnp.tanh(
        jnp.dot(feats.astype(jnp.bfloat16), wp_ref[...],
                preferred_element_type=jnp.float32) + b_pool)        # (M, 256)

    # Dropout(p=0.1) is identity in eval mode; gradient reversal is identity
    # in the forward pass, so both heads consume the same pooled features.
    # --- fused heads, layer 1: [h_sent | h_dom] -------------------------------
    h = jnp.maximum(
        jnp.dot(pooled.astype(jnp.bfloat16), w1_ref[...],
                preferred_element_type=jnp.float32) + b1, 0.0)       # (M, 256)

    # --- fused heads, layer 2: one lane-dense (M, 128) logit slab -------------
    out_ref[...] = (
        jnp.dot(h.astype(jnp.bfloat16), w2_ref[...],
                preferred_element_type=jnp.float32) + b2)            # (M, 128)


# --------------------------------- wrapper -----------------------------------
@jax.jit
def sentiment_domain_forward(input_ids, attention_mask, token_type_ids, params):
    """Embedding gather in JAX; masked mean + fused matmul chain in Pallas."""
    batch = input_ids.shape[0]

    emb = (params["word_emb"][input_ids]
           + params["type_emb"][token_type_ids]
           + params["pos_emb"][None, :, :]).astype(jnp.bfloat16)      # (B, S, H)

    mask_f = attention_mask.astype(jnp.float32)                       # (B, S)
    denom = jnp.maximum(jnp.sum(mask_f, axis=1, keepdims=True), 1.0)
    wrow = mask_f / denom                                             # 1/denom folded in

    # Pad M up to a multiple of 16 so the bf16 (16,128) LHS tile is full.
    m_pad = max(SUBLANE_PACK, ((batch + SUBLANE_PACK - 1) // SUBLANE_PACK) * SUBLANE_PACK)
    pad = m_pad - batch
    if pad:
        emb = jnp.pad(emb, ((0, pad), (0, 0), (0, 0)))
        wrow = jnp.pad(wrow, ((0, pad), (0, 0)))

    cost = pl.CostEstimate(
        flops=2 * m_pad * (S * H_BERT                    # weighted reduce
                           + H_BERT * H_BERT             # pooler
                           + H_BERT * H2                 # fused head layer 1
                           + H2 * CLS_PAD),              # fused head layer 2
        transcendentals=m_pad * H_BERT,                  # tanh
        bytes_accessed=(m_pad * S * H_BERT * 2           # emb (bf16)
                        + m_pad * S * 4                  # wrow (f32)
                        + (H_BERT * H_BERT + H_BERT * H2 + H2 * CLS_PAD) * 2  # weights
                        + BIAS_W * 4                     # biases
                        + m_pad * CLS_PAD * 4))          # output

    vmem_spec = pl.BlockSpec(memory_space=pltpu.MemorySpace.VMEM)
    out_pad = pl.pallas_call(
        sdm_kernel,
        out_shape=jax.ShapeDtypeStruct((m_pad, CLS_PAD), jnp.float32),
        in_specs=[vmem_spec] * 6,
        out_specs=vmem_spec,
        cost_estimate=cost,
    )(emb, wrow, params["w_pool"], params["w1_fused"], params["w2_fused"],
      params["biases"])

    # One contiguous (B, 4) slab: [sent0, sent1, dom0, dom1].
    packed = out_pad[:batch, :SENT_CLASSES + DOM_CLASSES]
    sentiment_output = packed[:, :SENT_CLASSES]
    domain_output = packed[:, SENT_CLASSES:SENT_CLASSES + DOM_CLASSES]
    return sentiment_output, domain_output


# ----------------------- deterministic parameter init ------------------------
def init_params(key):
    ks = jax.random.split(key, 8)

    def dense(k, fan_in, fan_out):
        lim = 1.0 / jnp.sqrt(fan_in)
        w = jax.random.uniform(k, (fan_in, fan_out), jnp.float32, -lim, lim)
        b = jnp.zeros((fan_out,), jnp.float32)
        return w, b

    w_pool, b_pool = dense(ks[0], H_BERT, H_BERT)
    w1_s, b1_s = dense(ks[1], H_BERT, HIDDEN)
    w2_s, b2_s = dense(ks[2], HIDDEN, SENT_CLASSES)
    w1_d, b1_d = dense(ks[3], H_BERT, HIDDEN)
    w2_d, b2_d = dense(ks[4], HIDDEN, DOM_CLASSES)

    # Fused first head layer: (H_BERT, 2*HIDDEN) = [W1_sent | W1_dom].
    w1_fused = jnp.concatenate([w1_s, w1_d], axis=1)
    b1_fused = jnp.concatenate([b1_s, b1_d], axis=0)

    # Fused second head layer as a block matrix into adjacent lane ranges:
    #   rows   0:128 -> cols 0:2  (sentiment logits)
    #   rows 128:256 -> cols 2:4  (domain logits); zeros elsewhere.
    w2_fused = jnp.zeros((H2, CLS_PAD), jnp.float32)
    w2_fused = w2_fused.at[:HIDDEN, :SENT_CLASSES].set(w2_s)
    w2_fused = w2_fused.at[HIDDEN:, DOM_OFF:DOM_OFF + DOM_CLASSES].set(w2_d)
    b2_fused = jnp.zeros((CLS_PAD,), jnp.float32)
    b2_fused = b2_fused.at[:SENT_CLASSES].set(b2_s)
    b2_fused = b2_fused.at[DOM_OFF:DOM_OFF + DOM_CLASSES].set(b2_d)

    # One packed bias vector (f32): (1, 640).
    biases = jnp.concatenate([b_pool, b1_fused, b2_fused], axis=0)[None, :]

    return {
        "word_emb": 0.02 * jax.random.normal(ks[5], (VOCAB, H_BERT), jnp.float32),
        "type_emb": 0.02 * jax.random.normal(ks[6], (TYPE_VOCAB, H_BERT), jnp.float32),
        "pos_emb": 0.02 * jax.random.normal(ks[7], (S, H_BERT), jnp.float32),
        "w_pool": w_pool.astype(jnp.bfloat16),
        "w1_fused": w1_fused.astype(jnp.bfloat16),
        "w2_fused": w2_fused.astype(jnp.bfloat16),
        "biases": biases,
    }


# ---------------------------- pure-JAX reference ------------------------------
def reference_forward(input_ids, attention_mask, token_type_ids, params):
    emb = (params["word_emb"][input_ids] + params["type_emb"][token_type_ids]
           + params["pos_emb"][None, :, :]).astype(jnp.float32)
    mask_f = attention_mask.astype(jnp.float32)
    denom = jnp.maximum(jnp.sum(mask_f, axis=1, keepdims=True), 1.0)
    feats = jnp.einsum("bs,bsh->bh", mask_f / denom, emb)

    wp = params["w_pool"].astype(jnp.float32)
    w1 = params["w1_fused"].astype(jnp.float32)
    w2 = params["w2_fused"].astype(jnp.float32)
    b = params["biases"][0]
    pooled = jnp.tanh(feats @ wp + b[:H_BERT])
    h = jnp.maximum(pooled @ w1 + b[H_BERT:H_BERT + H2], 0.0)
    logits = h @ w2 + b[H_BERT + H2:]
    return logits[:, :SENT_CLASSES], logits[:, DOM_OFF:DOM_OFF + DOM_CLASSES]


if __name__ == "__main__":
    key = jax.random.PRNGKey(0)
    k_ids, k_mask, k_types, k_params = jax.random.split(key, 4)

    input_ids = jax.random.randint(k_ids, (B, S), 0, VOCAB, dtype=jnp.int32)
    # lengths in [1, S]; attention_mask is 1 for real tokens, 0 for padding
    lengths = jax.random.randint(k_mask, (B, 1), 1, S + 1, dtype=jnp.int32)
    attention_mask = (jnp.arange(S, dtype=jnp.int32)[None, :] < lengths).astype(jnp.int32)
    token_type_ids = jax.random.randint(k_types, (B, S), 0, TYPE_VOCAB, dtype=jnp.int32)

    params = init_params(k_params)

    sentiment_out, domain_out = sentiment_domain_forward(
        input_ids, attention_mask, token_type_ids, params)
    jax.block_until_ready((sentiment_out, domain_out))

    assert sentiment_out.shape == (B, SENT_CLASSES)
    assert domain_out.shape == (B, DOM_CLASSES)
    assert bool(jnp.all(jnp.isfinite(sentiment_out)))
    assert bool(jnp.all(jnp.isfinite(domain_out)))

    # Loose tolerance: kernel uses bf16 activations/weights with f32 accumulation.
    ref_sent, ref_dom = reference_forward(input_ids, attention_mask,
                                          token_type_ids, params)
    assert float(jnp.max(jnp.abs(sentiment_out - ref_sent))) < 5e-2
    assert float(jnp.max(jnp.abs(domain_out - ref_dom))) < 5e-2

    print("KERNEL_OK")
</pallas_src>

<mosaic_0001>
module attributes {stable_mosaic.version = 11 : i64} {
  func.func @sdm_kernel(%arg0: memref<16x8x256xbf16, #tpu.memory_space<vmem>>, %arg1: memref<16x8xf32, #tpu.memory_space<vmem>>, %arg2: memref<256x256xbf16, #tpu.memory_space<vmem>>, %arg3: memref<256x256xbf16, #tpu.memory_space<vmem>>, %arg4: memref<256x128xbf16, #tpu.memory_space<vmem>>, %arg5: memref<1x640xf32, #tpu.memory_space<vmem>>, %arg6: memref<16x128xf32, #tpu.memory_space<vmem>>) attributes {dimension_semantics = [], scalar_prefetch = 0 : i64, scratch_operands = 0 : i64, tpu.core_type = #tpu.core_type<tc>} {
    %c0 = arith.constant 0 : index
    %c0_0 = arith.constant 0 : index
    %c0_1 = arith.constant 0 : index
    %0 = vector.load %arg0[%c0, %c0_0, %c0_1] : memref<16x8x256xbf16, #tpu.memory_space<vmem>>, vector<16x8x256xbf16>
    %1 = arith.extf %0 : vector<16x8x256xbf16> to vector<16x8x256xf32>
    %c0_2 = arith.constant 0 : index
    %c0_3 = arith.constant 0 : index
    %2 = vector.load %arg1[%c0_2, %c0_3] : memref<16x8xf32, #tpu.memory_space<vmem>>, vector<16x8xf32>
    %3 = vector.shape_cast %2 : vector<16x8xf32> to vector<16x8x1xf32>
    %4 = vector.broadcast %3 : vector<16x8x1xf32> to vector<16x8x256xf32>
    %5 = arith.mulf %1, %4 : vector<16x8x256xf32>
    %cst = arith.constant dense<0.000000e+00> : vector<16x256xf32>
    %6 = vector.multi_reduction <add>, %5, %cst [1] : vector<16x8x256xf32> to vector<16x256xf32>
    %c0_4 = arith.constant 0 : index
    %c0_5 = arith.constant 0 : index
    %7 = vector.load %arg5[%c0_4, %c0_5] : memref<1x640xf32, #tpu.memory_space<vmem>>, vector<1x256xf32>
    %c0_6 = arith.constant 0 : index
    %c256 = arith.constant 256 : index
    %8 = vector.load %arg5[%c0_6, %c256] : memref<1x640xf32, #tpu.memory_space<vmem>>, vector<1x256xf32>
    %c0_7 = arith.constant 0 : index
    %c512 = arith.constant 512 : index
    %9 = vector.load %arg5[%c0_7, %c512] : memref<1x640xf32, #tpu.memory_space<vmem>>, vector<1x128xf32>
    %10 = arith.truncf %6 : vector<16x256xf32> to vector<16x256xbf16>
    %c0_8 = arith.constant 0 : index
    %c0_9 = arith.constant 0 : index
    %11 = vector.load %arg2[%c0_8, %c0_9] : memref<256x256xbf16, #tpu.memory_space<vmem>>, vector<256x256xbf16>
    %cst_10 = arith.constant dense<0.000000e+00> : vector<16x256xf32>
    %12 = tpu.matmul %10, %11, %cst_10 {dimension_numbers = #tpu.dot_dimension_numbers<[1], [0], [0], [1], [0, 0, 1, 1], [], []>} : vector<16x256xbf16>, vector<256x256xbf16>, vector<16x256xf32> -> vector<16x256xf32>
    %13 = vector.broadcast %7 : vector<1x256xf32> to vector<16x256xf32>
    %14 = arith.addf %12, %13 : vector<16x256xf32>
    %15 = math.tanh %14 : vector<16x256xf32>
    %16 = arith.truncf %15 : vector<16x256xf32> to vector<16x256xbf16>
    %c0_11 = arith.constant 0 : index
    %c0_12 = arith.constant 0 : index
    %17 = vector.load %arg3[%c0_11, %c0_12] : memref<256x256xbf16, #tpu.memory_space<vmem>>, vector<256x256xbf16>
    %cst_13 = arith.constant dense<0.000000e+00> : vector<16x256xf32>
    %18 = tpu.matmul %16, %17, %cst_13 {dimension_numbers = #tpu.dot_dimension_numbers<[1], [0], [0], [1], [0, 0, 1, 1], [], []>} : vector<16x256xbf16>, vector<256x256xbf16>, vector<16x256xf32> -> vector<16x256xf32>
    %19 = vector.broadcast %8 : vector<1x256xf32> to vector<16x256xf32>
    %20 = arith.addf %18, %19 : vector<16x256xf32>
    %cst_14 = arith.constant 0.000000e+00 : f32
    %21 = vector.broadcast %cst_14 : f32 to vector<16x256xf32>
    %22 = arith.maximumf %20, %21 : vector<16x256xf32>
    %23 = arith.truncf %22 : vector<16x256xf32> to vector<16x256xbf16>
    %c0_15 = arith.constant 0 : index
    %c0_16 = arith.constant 0 : index
    %24 = vector.load %arg4[%c0_15, %c0_16] : memref<256x128xbf16, #tpu.memory_space<vmem>>, vector<256x128xbf16>
    %cst_17 = arith.constant dense<0.000000e+00> : vector<16x128xf32>
    %25 = tpu.matmul %23, %24, %cst_17 {dimension_numbers = #tpu.dot_dimension_numbers<[1], [0], [0], [1], [0, 0, 1, 1], [], []>} : vector<16x256xbf16>, vector<256x128xbf16>, vector<16x128xf32> -> vector<16x128xf32>
    %26 = vector.broadcast %9 : vector<1x128xf32> to vector<16x128xf32>
    %27 = arith.addf %25, %26 : vector<16x128xf32>
    %c0_18 = arith.constant 0 : index
    %c0_19 = arith.constant 0 : index
    %28 = vector.load %arg6[%c0_18, %c0_19] : memref<16x128xf32, #tpu.memory_space<vmem>>, vector<16x128xf32>
    tpu.vector_store %arg6[%c0_18, %c0_19], %27 {strides = array<i32>} : memref<16x128xf32, #tpu.memory_space<vmem>>, vector<16x128xf32>,
    return
  }
}

</mosaic_0001>

<bundles_post_ra>
// kernel: sentiment_domain_forward.1
= control target key start
LH: loop header
LB: loop body
LE: loop exit
PB: predicated region body
PF: predicated region fallthrough
CT: control target
= control target key end

     0   :  { %v74_v0 = vlaneseq  ;;  %vm552_vm0 = vcmask 1041409   ;;  %vm554_vm1 = vcmask 1042434   ;;  %vm556_vm2 = vcmask 1043459   ;;  %s2019_s1 = inlined_call_operand.vmem [shape: f32[16,8], index: 1, kind: input, shape index: {}]   ;;  %s2020_s2 = inlined_call_operand.vmem [shape: bf16[256,256], index: 2, kind: input, shape index: {}]   ;;  %s2021_s3 = inlined_call_operand.vmem [shape: bf16[256,256], index: 3, kind: input, shape index: {}]   ;;  %s2022_s0 = inlined_call_operand.vmem [shape: bf16[16,8,256], index: 0, kind: input, shape index: {}]   ;;  %s2023_s4 = inlined_call_operand.vmem [shape: bf16[256,128], index: 4, kind: input, shape index: {}]   ;;  %s2024_s5 = inlined_call_operand.vmem [shape: f32[1,640], index: 5, kind: input, shape index: {}]   ;;  %s2025_s6 = inlined_call_operand.vmem [shape: f32[16,128], index: 6, kind: output, shape index: {}]  }
   0x1   :  { %v1494_v1 = vld [vmem:[%s2019_s1 + $0x8] sm:$0xff]  ;;  %v1499_v2 = vld [vmem:[%s2019_s1] sm:$0xff]  ;;  %v1336_v4 = vld [vmem:[%s2020_s2 + $0x74] ss:$8 sps:$4 sm:$0xff]   ;;  %vm558_vm3 = vcmask 1044484   ;;  %vm560_vm4 = vcmask 1045509  }
   0x2   :  { %v1501_v3 = vshrl.u32 %v74_v0, 7  ;;  %v1338_v5 = vld [vmem:[%s2020_s2 + $0x70] ss:$8 sps:$4 sm:$0xff]   ;;  %v1339_v6 = vld [vmem:[%s2020_s2 + $0x64] ss:$8 sps:$4 sm:$0xff]   ;;  %751 = vmatprep.subr.bf16.mxu0 %v1336_v4  ;;  %vm562_vm5 = vcmask 1046534  }
   0x3   :  { %752 = vmatpush1.bf16.msra.mxu0 %v1338_v5  ;;  %v1341_v9 = vld [vmem:[%s2020_s2 + $0x60] ss:$8 sps:$4 sm:$0xff]   ;;  %v1342_v12 = vld [vmem:[%s2020_s2 + $0x54] ss:$8 sps:$4 sm:$0xff]   ;;  %v1344_v16 = vld [vmem:[%s2020_s2 + $0x50] ss:$8 sps:$4 sm:$0xff]  }
   0x4   :  { %v1513_v7 = vsub.s32 0, %v1501_v3  ;;  %v1516_v8 = vsub.s32 1, %v1501_v3  ;;  %753 = vmatprep.subr.bf16.mxu0 %v1339_v6  ;;  %v90_v15 = vsub.s32 2, %v1501_v3  ;;  %v1345_v17 = vld [vmem:[%s2020_s2 + $0x44] ss:$8 sps:$4 sm:$0xff]   ;;  %v97_v20 = vsub.s32 3, %v1501_v3 }
   0x5   :  { %v1347_v21 = vld [vmem:[%s2020_s2 + $0x40] ss:$8 sps:$4 sm:$0xff]   ;;  %v1348_v22 = vld [vmem:[%s2020_s2 + $0x34] ss:$8 sps:$4 sm:$0xff]   ;;  %v1350_v23 = vld [vmem:[%s2020_s2 + $0x30] ss:$8 sps:$4 sm:$0xff]  }
   0x6   :  { %v133_v10 = vrot.slane %v1494_v1, %v1513_v7  ;;  %v77_v11 = vrot.slane %v1499_v2, %v1513_v7  ;;  %v140_v13 = vrot.slane %v1494_v1, %v1516_v8  ;;  %v84_v14 = vrot.slane %v1499_v2, %v1516_v8  ;;  %v1351_v27 = vld [vmem:[%s2020_s2 + $0x24] ss:$8 sps:$4 sm:$0xff]   ;;  %v1353_v31 = vld [vmem:[%s2020_s2 + $0x20] ss:$8 sps:$4 sm:$0xff]   ;;  %v1354_v32 = vld [vmem:[%s2020_s2 + $0x14] ss:$8 sps:$4 sm:$0xff]  }
   0x7   :  { %754 = vmatpush1.bf16.msra.mxu0 %v1341_v9  ;;  %v147_v18 = vrot.slane %v1494_v1, %v90_v15  ;;  %v91_v19 = vrot.slane %v1499_v2, %v90_v15  ;;  %v154_v24 = vrot.slane %v1494_v1, %v97_v20  ;;  %v98_v25 = vrot.slane %v1499_v2, %v97_v20  ;;  %v1356_v36 = vld [vmem:[%s2020_s2 + $0x10] ss:$8 sps:$4 sm:$0xff]   ;;  %v1357_v37 = vld [vmem:[%s2020_s2 + $0x4] ss:$8 sps:$4 sm:$0xff]   ;;  %v1359_v41 = vld [vmem:[%s2020_s2] ss:$8 sps:$4 sm:$0xff]  }
   0x8   :  { %135 = vbcast.lane.b32.xlu1 %v133_v10, 256  ;;  %79 = vbcast.lane.b32.xlu0 %v77_v11, 256  ;;  %v104_v26 = vsub.s32 4, %v1501_v3  ;;  %v111_v30 = vsub.s32 5, %v1501_v3  ;;  %v118_v35 = vsub.s32 6, %v1501_v3  ;;  %v125_v40 = vsub.s32 7, %v1501_v3 }
   0x9   :  { %755 = vmatprep.subr.bf16.mxu0 %v1342_v12  ;;  %v1360_v44 = vld [vmem:[%s2020_s2 + $0xf4] ss:$8 sps:$4 sm:$0xff]   ;;  %v1362_v45 = vld [vmem:[%s2020_s2 + $0xf0] ss:$8 sps:$4 sm:$0xff]   ;;  %v1363_v46 = vld [vmem:[%s2020_s2 + $0xe4] ss:$8 sps:$4 sm:$0xff]  }
   0xa   :  { %v161_v28 = vrot.slane %v1494_v1, %v104_v26  ;;  %v105_v29 = vrot.slane %v1499_v2, %v104_v26  ;;  %v168_v33 = vrot.slane %v1494_v1, %v111_v30  ;;  %v112_v34 = vrot.slane %v1499_v2, %v111_v30  ;;  %v1365_v47 = vld [vmem:[%s2020_s2 + $0xe0] ss:$8 sps:$4 sm:$0xff]   ;;  %v1366_v48 = vld [vmem:[%s2020_s2 + $0xd4] ss:$8 sps:$4 sm:$0xff]   ;;  %v1368_v49 = vld [vmem:[%s2020_s2 + $0xd0] ss:$8 sps:$4 sm:$0xff]  }
   0xb   :  { %756 = vmatpush1.bf16.msra.mxu0 %v1344_v16  ;;  %v175_v38 = vrot.slane %v1494_v1, %v118_v35  ;;  %v119_v39 = vrot.slane %v1499_v2, %v118_v35  ;;  %v182_v42 = vrot.slane %v1494_v1, %v125_v40  ;;  %v126_v43 = vrot.slane %v1499_v2, %v125_v40  ;;  %v1369_v50 = vld [vmem:[%s2020_s2 + $0xc4] ss:$8 sps:$4 sm:$0xff]   ;;  %v1371_v51 = vld [vmem:[%s2020_s2 + $0xc0] ss:$8 sps:$4 sm:$0xff]   ;;  %v1372_v52 = vld [vmem:[%s2020_s2 + $0xb4] ss:$8 sps:$4 sm:$0xff]  }
   0xc   :  { %142 = vbcast.lane.b32.xlu1 %v140_v13, 256  ;;  %86 = vbcast.lane.b32.xlu0 %v84_v14, 256  ;;  %v1374_v53 = vld [vmem:[%s2020_s2 + $0xb0] ss:$8 sps:$4 sm:$0xff]   ;;  %v1375_v54 = vld [vmem:[%s2020_s2 + $0xa4] ss:$8 sps:$4 sm:$0xff]  }
   0xd   :  { %757 = vmatprep.subr.bf16.mxu0 %v1345_v17  ;;  %v1377_v55 = vld [vmem:[%s2020_s2 + $0xa0] ss:$8 sps:$4 sm:$0xff]   ;;  %v1378_v56 = vld [vmem:[%s2020_s2 + $0x94] ss:$8 sps:$4 sm:$0xff]   ;;  %v1380_v57 = vld [vmem:[%s2020_s2 + $0x90] ss:$8 sps:$4 sm:$0xff]  }
   0xe   :  { %v1381_v58 = vld [vmem:[%s2020_s2 + $0x84] ss:$8 sps:$4 sm:$0xff]   ;;  %v1383_v59 = vld [vmem:[%s2020_s2 + $0x80] ss:$8 sps:$4 sm:$0xff]   ;;  %v1384_v60 = vld [vmem:[%s2021_s3 + $0x74] ss:$8 sps:$4 sm:$0xff]  }
   0xf   :  { %758 = vmatpush1.bf16.msra.mxu0 %v1347_v21  ;;  %v1386_v61 = vld [vmem:[%s2021_s3 + $0x70] ss:$8 sps:$4 sm:$0xff]   ;;  %1003 = vmatprep.subr.bf16.mxu1 %v1384_v60  ;;  %v1387_v62 = vld [vmem:[%s2021_s3 + $0x64] ss:$8 sps:$4 sm:$0xff]   ;;  %v1389_v63 = vld [vmem:[%s2021_s3 + $0x60] ss:$8 sps:$4 sm:$0xff]  }
  0x10   :  { %149 = vbcast.lane.b32.xlu1 %v147_v18, 256  ;;  %93 = vbcast.lane.b32.xlu0 %v91_v19, 256  ;;  %v1390_v0 = vld [vmem:[%s2021_s3 + $0x54] ss:$8 sps:$4 sm:$0xff]   ;;  %v1392_v1 = vld [vmem:[%s2021_s3 + $0x50] ss:$8 sps:$4 sm:$0xff]  }
  0x11   :  { %759 = vmatprep.subr.bf16.mxu0 %v1348_v22  ;;  %1004 = vmatpush1.bf16.msra.mxu1 %v1386_v61  ;;  %v1393_v2 = vld [vmem:[%s2021_s3 + $0x44] ss:$8 sps:$4 sm:$0xff]   ;;  %v1395_v3 = vld [vmem:[%s2021_s3 + $0x40] ss:$8 sps:$4 sm:$0xff]   ;;  %v1396_v4 = vld [vmem:[%s2021_s3 + $0x34] ss:$8 sps:$4 sm:$0xff]  }
  0x12   :  { %1005 = vmatprep.subr.bf16.mxu1 %v1387_v62  ;;  %v1398_v5 = vld [vmem:[%s2021_s3 + $0x30] ss:$8 sps:$4 sm:$0xff]   ;;  %v1399_v6 = vld [vmem:[%s2021_s3 + $0x24] ss:$8 sps:$4 sm:$0xff]   ;;  %v1401_v9 = vld [vmem:[%s2021_s3 + $0x20] ss:$8 sps:$4 sm:$0xff]  }
  0x13   :  { %760 = vmatpush1.bf16.msra.mxu0 %v1350_v23  ;;  %v1402_v10 = vld [vmem:[%s2021_s3 + $0x14] ss:$8 sps:$4 sm:$0xff]   ;;  %v1404_v11 = vld [vmem:[%s2021_s3 + $0x10] ss:$8 sps:$4 sm:$0xff]   ;;  %v1405_v12 = vld [vmem:[%s2021_s3 + $0x4] ss:$8 sps:$4 sm:$0xff]  }
  0x14   :  { %156 = vbcast.lane.b32.xlu1 %v154_v24, 256  ;;  %100 = vbcast.lane.b32.xlu0 %v98_v25, 256  ;;  %v1407_v13 = vld [vmem:[%s2021_s3] ss:$8 sps:$4 sm:$0xff]   ;;  %v1408_v14 = vld [vmem:[%s2021_s3 + $0xf4] ss:$8 sps:$4 sm:$0xff]  }
  0x15   :  { %761 = vmatprep.subr.bf16.mxu0 %v1351_v27  ;;  %1006 = vmatpush1.bf16.msra.mxu1 %v1389_v63  ;;  %v1410_v15 = vld [vmem:[%s2021_s3 + $0xf0] ss:$8 sps:$4 sm:$0xff]   ;;  %v1411_v16 = vld [vmem:[%s2021_s3 + $0xe4] ss:$8 sps:$4 sm:$0xff]   ;;  %v1413_v22 = vld [vmem:[%s2021_s3 + $0xe0] ss:$8 sps:$4 sm:$0xff]  }
  0x16   :  { %1007 = vmatprep.subr.bf16.mxu1 %v1390_v0  ;;  %v32_v17 = vld [vmem:[%s2022_s0 + $0x40] sm:$0xff]  ;;  %v1697_v19 = vld [vmem:[%s2022_s0 + $0x48] sm:$0xff]  ;;  %v1707_v21 = vld [vmem:[%s2022_s0 + $0x50] sm:$0xff]  ;;  %vm564_vm6 = vcmask 1047559  }
  0x17   :  { %762 = vmatpush1.bf16.msra.mxu0 %v1353_v31  ;;  %v24_v18 = vld [vmem:[%s2022_s0] sm:$0xff]  ;;  %v1702_v20 = vld [vmem:[%s2022_s0 + $0x8] sm:$0xff]  ;;  %v56_v23 = vunpack.c.l.bf16 %v32_v17  ;;  %v57_v24 = vunpack.c.h.bf16 %v32_v17  ;;  %v1715_v25 = vld [vmem:[%s2022_s0 + $0x10] sm:$0xff]  ;;  %v59_v30 = vunpack.c.h.bf16 %v1697_v19  ;;  %v60_v35 = vunpack.c.l.bf16 %v1707_v21 }
  0x18   :  { %163 = vbcast.lane.b32.xlu1 %v161_v28, 256  ;;  %107 = vbcast.lane.b32.xlu0 %v105_v29, 256  ;;  %v1720_v26 = vld [vmem:[%s2022_s0 + $0x58] sm:$0xff]  ;;  %v40_v27 = vunpack.c.l.bf16 %v24_v18  ;;  %v41_v28 = vunpack.c.h.bf16 %v24_v18  ;;  %v58_v29 = vunpack.c.l.bf16 %v1697_v19  ;;  %v45_v40 = vunpack.c.h.bf16 %v1715_v25 }
  0x19   :  { %763 = vmatprep.subr.bf16.mxu0 %v1354_v32  ;;  %1008 = vmatpush1.bf16.msra.mxu1 %v1392_v1  ;;  %v1727_v31 = vld [vmem:[%s2022_s0 + $0x18] sm:$0xff]  ;;  %v1732_v32 = vld [vmem:[%s2022_s0 + $0x60] sm:$0xff] }
  0x1a   :  { %1009 = vmatprep.subr.bf16.mxu1 %v1393_v2  ;;  %v1778_v60 = vld [vmem:[%s2022_s0 + $0x78] sm:$0xff] }
  0x1b   :  { %764 = vmatpush1.bf16.msra.mxu0 %v1356_v36  ;;  %v61_v36 = vunpack.c.h.bf16 %v1707_v21 }
  0x1c   :  { %170 = vbcast.lane.b32.xlu1 %v168_v33, 256  ;;  %114 = vbcast.lane.b32.xlu0 %v112_v34, 256  ;;  %v42_v33 = vunpack.c.l.bf16 %v1702_v20  ;;  %v43_v34 = vunpack.c.h.bf16 %v1702_v20 }
  0x1d   :  { %765 = vmatprep.subr.bf16.mxu0 %v1357_v37  ;;  %1010 = vmatpush1.bf16.msra.mxu1 %v1395_v3  ;;  %v1741_v37 = vld [vmem:[%s2022_s0 + $0x20] sm:$0xff] }
  0x1e   :  { %1011 = vmatprep.subr.bf16.mxu1 %v1396_v4 }
  0x1f   :  { %766 = vmatpush1.bf16.msra.mxu0 %v1359_v41  ;;  %v62_v41 = vunpack.c.l.bf16 %v1720_v26 }
  0x20   :  { %177 = vbcast.lane.b32.xlu1 %v175_v38, 256  ;;  %121 = vbcast.lane.b32.xlu0 %v119_v39, 256  ;;  %v1746_v38 = vld [vmem:[%s2022_s0 + $0x68] sm:$0xff]  ;;  %v44_v39 = vunpack.c.l.bf16 %v1715_v25 }
  0x21   :  { %767 = vmatprep.subr.bf16.mxu0 %v1360_v44  ;;  %1012 = vmatpush1.bf16.msra.mxu1 %v1398_v5  ;;  %v47_v44 = vunpack.c.h.bf16 %v1727_v31 }
  0x22   :  { %1013 = vmatprep.subr.bf16.mxu1 %v1399_v6 }
  0x23   :  { %768 = vmatpush2.bf16.msra.mxu0 %v1362_v45  ;;  %v64_v45 = vunpack.c.l.bf16 %v1732_v32 }
  0x24   :  { %184 = vbcast.lane.b32.xlu1 %v182_v42, 256  ;;  %128 = vbcast.lane.b32.xlu0 %v126_v43, 256  ;;  %v63_v42 = vunpack.c.h.bf16 %v1720_v26  ;;  %v46_v43 = vunpack.c.l.bf16 %v1727_v31 }
  0x25   :  { %769 = vmatprep.subr.bf16.mxu0 %v1363_v46  ;;  %1014 = vmatpush1.bf16.msra.mxu1 %v1401_v9  ;;  %v65_v46 = vunpack.c.h.bf16 %v1732_v32 }
  0x26   :  { %1015 = vmatprep.subr.bf16.mxu1 %v1402_v10 }
  0x27   :  { %770 = vmatpush2.bf16.msra.mxu0 %v1365_v47  ;;  %v1759_v47 = vld [vmem:[%s2022_s0 + $0x28] sm:$0xff] }
  0x28   :  { %771 = vmatprep.subr.bf16.mxu0 %v1366_v48  ;;  %v1764_v48 = vld [vmem:[%s2022_s0 + $0x70] sm:$0xff]  ;;  %v50_v61 = vunpack.c.l.bf16 %v1759_v47  ;;  %v51_v62 = vunpack.c.h.bf16 %v1759_v47 }
  0x29   :  { %1016 = vmatpush1.bf16.msra.mxu1 %v1404_v11  ;;  %v68_v63 = vunpack.c.l.bf16 %v1764_v48 }
  0x2a   :  { %1017 = vmatprep.subr.bf16.mxu1 %v1405_v12 }
  0x2b   :  { %772 = vmatpush2.bf16.msra.mxu0 %v1368_v49 }
  0x2c   :  { %773 = vmatprep.subr.bf16.mxu0 %v1369_v50 }
  0x2d   :  { %1018 = vmatpush1.bf16.msra.mxu1 %v1407_v13 }
  0x2e   :  { %1019 = vmatprep.subr.bf16.mxu1 %v1408_v14 }
  0x2f   :  { %774 = vmatpush2.bf16.msra.mxu0 %v1371_v51  ;;  %v48_v51 = vunpack.c.l.bf16 %v1741_v37 }
  0x30   :  { %775 = vmatprep.subr.bf16.mxu0 %v1372_v52  ;;  %v49_v52 = vunpack.c.h.bf16 %v1741_v37 }
  0x31   :  { %1020 = vmatpush2.bf16.msra.mxu1 %v1410_v15 }
  0x32   :  { %1021 = vmatprep.subr.bf16.mxu1 %v1411_v16 }
  0x33   :  { %776 = vmatpush2.bf16.msra.mxu0 %v1374_v53  ;;  %v66_v53 = vunpack.c.l.bf16 %v1746_v38 }
  0x34   :  { %777 = vmatprep.subr.bf16.mxu0 %v1375_v54  ;;  %v67_v54 = vunpack.c.h.bf16 %v1746_v38 }
  0x35   :  { %1022 = vmatpush2.bf16.msra.mxu1 %v1413_v22 }
  0x37   :  { %778 = vmatpush2.bf16.msra.mxu0 %v1377_v55 }
  0x38   :  { %779 = vmatprep.subr.bf16.mxu0 %v1378_v56 }
  0x3b   :  { %780 = vmatpush2.bf16.msra.mxu0 %v1380_v57 }
  0x3c   :  { %781 = vmatprep.subr.bf16.mxu0 %v1381_v58 }
  0x3f   :  { %782 = vmatpush2.bf16.msra.mxu0 %v1383_v59  ;;  %v1773_v59 = vld [vmem:[%s2022_s0 + $0x30] sm:$0xff] }
  0x7a   :  { %v136_v49 = vpop.permute.xlu1 %135  ;;  %v80_v50 = vpop.permute.xlu0 %79 }
  0x7b   :  { %v202_v55 = vmul.f32 %v136_v49, %v56_v23  ;;  %v203_v56 = vmul.f32 %v136_v49, %v57_v24  ;;  %v186_v57 = vmul.f32 %v80_v50, %v40_v27  ;;  %v187_v58 = vmul.f32 %v80_v50, %v41_v28 }
  0x7d   :  { %v314_v1 = vrot.slane %v202_v55, 4  ;;  %v320_v2 = vrot.slane %v203_v56, 4  ;;  %v218_v3 = vrot.slane %v186_v57, 4  ;;  %v224_v4 = vrot.slane %v187_v58, 4 }
  0x7e   :  { %v143_v5 = vpop.permute.xlu1 %142  ;;  %v87_v6 = vpop.permute.xlu0 %86 }
  0x7f   :  { %v315_v13 = vadd.f32 %v314_v1, %v202_v55  ;;  %v321_v14 = vadd.f32 %v320_v2, %v203_v56  ;;  %v219_v15 = vadd.f32 %v218_v3, %v186_v57  ;;  %v225_v16 = vadd.f32 %v224_v4, %v187_v58 }
  0x80   :  { %v204_v17 = vmul.f32 %v143_v5, %v58_v29  ;;  %v205_v18 = vmul.f32 %v143_v5, %v59_v30  ;;  %v188_v19 = vmul.f32 %v87_v6, %v42_v33  ;;  %v189_v20 = vmul.f32 %v87_v6, %v43_v34  ;;  %v1791_v5 = vld [vmem:[%s2022_s0 + $0x38] sm:$0xff] }
  0x81   :  { %v316_v22 = vrot.slane %v315_v13, 2  ;;  %v322_v23 = vrot.slane %v321_v14, 2  ;;  %v220_v24 = vrot.slane %v219_v15, 2  ;;  %v226_v27 = vrot.slane %v225_v16, 2 }
  0x82   :  { %v326_v28 = vrot.slane %v204_v17, 4  ;;  %v332_v49 = vrot.slane %v205_v18, 4  ;;  %v230_v50 = vrot.slane %v188_v19, 4  ;;  %v236_v10 = vrot.slane %v189_v20, 4 }
  0x83   :  { %v317_v9 = vadd.f32 %v316_v22, %v315_v13  ;;  %v323_v11 = vadd.f32 %v322_v23, %v321_v14  ;;  %v221_v0 = vadd.f32 %v220_v24, %v219_v15  ;;  %v227_v12 = vadd.f32 %v226_v27, %v225_v16 }
  0x84   :  { %v327_v55 = vadd.f32 %v326_v28, %v204_v17  ;;  %v333_v56 = vadd.f32 %v332_v49, %v205_v18  ;;  %v231_v57 = vadd.f32 %v230_v50, %v188_v19  ;;  %v237_v58 = vadd.f32 %v236_v10, %v189_v20  ;;  %v150_v50 = vpop.permute.xlu1 %149 }
  0x85   :  { %v318_v29 = vrot.slane %v317_v9, 1  ;;  %v324_v30 = vrot.slane %v323_v11, 1  ;;  %v222_v33 = vrot.slane %v221_v0, 1  ;;  %v228_v34 = vrot.slane %v227_v12, 1 }
  0x86   :  { %v328_v1 = vrot.slane %v327_v55, 2  ;;  %v334_v2 = vrot.slane %v333_v56, 2  ;;  %v232_v3 = vrot.slane %v231_v57, 2  ;;  %v238_v4 = vrot.slane %v237_v58, 2 }
  0x87   :  { %v319_v6 = vadd.f32 %v318_v29, %v317_v9  ;;  %v325_v13 = vadd.f32 %v324_v30, %v323_v11  ;;  %v223_v14 = vadd.f32 %v222_v33, %v221_v0  ;;  %v229_v15 = vadd.f32 %v228_v34, %v227_v12  ;;  %v94_v9 = vpop.permute.xlu0 %93 }
  0x88   :  { %v329_v16 = vadd.f32 %v328_v1, %v327_v55  ;;  %v335_v10 = vadd.f32 %v334_v2, %v333_v56  ;;  %v233_v17 = vadd.f32 %v232_v3, %v231_v57  ;;  %v239_v18 = vadd.f32 %v238_v4, %v237_v58 }
  0x89   :  { %v429_v19 = vpack.c.bf16 %v319_v6, %v319_v6  ;;  %v430_v20 = vpack.c.bf16 %v325_v13, %v325_v13  ;;  %v54_v22 = vunpack.c.l.bf16 %v1791_v5  ;;  %v55_v23 = vunpack.c.h.bf16 %v1791_v5 }
  0x8a   :  { %v330_v24 = vrot.slane %v329_v16, 1  ;;  %v336_v27 = vrot.slane %v335_v10, 1  ;;  %v234_v28 = vrot.slane %v233_v17, 1  ;;  %v240_v49 = vrot.slane %v239_v18, 1 }
  0x8b   :  { %v536_v11 = vunpack.c.l.b16 %v429_v19  ;;  %v537_v0 = vunpack.c.l.b16 %v430_v20  ;;  %v413_v12 = vpack.c.bf16 %v223_v14, %v223_v14  ;;  %v414_v29 = vpack.c.bf16 %v229_v15, %v229_v15 }
  0x8c   :  { %v331_v55 = vadd.f32 %v330_v24, %v329_v16  ;;  %v337_v56 = vadd.f32 %v336_v27, %v335_v10  ;;  %v235_v57 = vadd.f32 %v234_v28, %v233_v17  ;;  %v241_v58 = vadd.f32 %v240_v49, %v239_v18  ;;  %v101_v24 = vpop.permute.xlu0 %100 }
  0x8d   :  { %v206_v30 = vmul.f32 %v150_v50, %v60_v35  ;;  %v207_v33 = vmul.f32 %v150_v50, %v61_v36  ;;  %v190_v34 = vmul.f32 %v94_v9, %v44_v39  ;;  %v191_v1 = vmul.f32 %v94_v9, %v45_v40  ;;  %v157_v39 = vpop.permute.xlu1 %156 }
  0x8e   :  { %v431_v2 = vpack.c.bf16 %v331_v55, %v331_v55  ;;  %v432_v3 = vpack.c.bf16 %v337_v56, %v337_v56  ;;  %v415_v4 = vpack.c.bf16 %v235_v57, %v235_v57  ;;  %v416_v6 = vpack.c.bf16 %v241_v58, %v241_v58 }
  0x8f   :  { %v338_v13 = vrot.slane %v206_v30, 4  ;;  %v344_v14 = vrot.slane %v207_v33, 4  ;;  %v242_v15 = vrot.slane %v190_v34, 4  ;;  %v248_v16 = vrot.slane %v191_v1, 4 }
  0x90   :  { %v520_v10 = vunpack.c.l.b16 %v413_v12  ;;  %v521_v17 = vunpack.c.l.b16 %v414_v29  ;;  %v538_v35 = vunpack.c.l.b16 %v431_v2  ;;  %v539_v18 = vunpack.c.l.b16 %v432_v3 }
  0x91   :  { %v339_v21 = vadd.f32 %v338_v13, %v206_v30  ;;  %v345_v36 = vadd.f32 %v344_v14, %v207_v33  ;;  %v243_v19 = vadd.f32 %v242_v15, %v190_v34  ;;  %v249_v20 = vadd.f32 %v248_v16, %v191_v1 }
  0x92   :  { %v1804_v25 = vsel %vm552_vm0, %v538_v35, %v536_v11  ;;  %v1807_v40 = vsel %vm552_vm0, %v539_v18, %v537_v0  ;;  %v522_v27 = vunpack.c.l.b16 %v415_v4  ;;  %v523_v28 = vunpack.c.l.b16 %v416_v6 }
  0x93   :  { %v340_v49 = vrot.slane %v339_v21, 2  ;;  %v346_v50 = vrot.slane %v345_v36, 2  ;;  %v244_v9 = vrot.slane %v243_v19, 2  ;;  %v250_v12 = vrot.slane %v249_v20, 2 }
  0x94   :  { %v208_v29 = vmul.f32 %v157_v39, %v62_v41  ;;  %v209_v55 = vmul.f32 %v157_v39, %v63_v42  ;;  %v192_v56 = vmul.f32 %v101_v24, %v46_v43  ;;  %v193_v11 = vmul.f32 %v101_v24, %v47_v44 }
  0x95   :  { %v341_v0 = vadd.f32 %v340_v49, %v339_v21  ;;  %v347_v57 = vadd.f32 %v346_v50, %v345_v36  ;;  %v245_v58 = vadd.f32 %v244_v9, %v243_v19  ;;  %v251_v30 = vadd.f32 %v250_v12, %v249_v20  ;;  %v164_v12 = vpop.permute.xlu1 %163 }
  0x96   :  { %v350_v33 = vrot.slane %v208_v29, 4  ;;  %v356_v34 = vrot.slane %v209_v55, 4  ;;  %v254_v1 = vrot.slane %v192_v56, 4  ;;  %v260_v2 = vrot.slane %v193_v11, 4 }
  0x97   :  { %v342_v3 = vrot.slane %v341_v0, 1  ;;  %v348_v4 = vrot.slane %v347_v57, 1  ;;  %v246_v41 = vrot.slane %v245_v58, 1  ;;  %v252_v6 = vrot.slane %v251_v30, 1 }
  0x98   :  { %v351_v26 = vadd.f32 %v350_v33, %v208_v29  ;;  %v357_v42 = vadd.f32 %v356_v34, %v209_v55  ;;  %v255_v13 = vadd.f32 %v254_v1, %v192_v56  ;;  %v261_v14 = vadd.f32 %v260_v2, %v193_v11  ;;  %v108_v33 = vpop.permute.xlu0 %107 }
  0x99   :  { %v343_v43 = vadd.f32 %v342_v3, %v341_v0  ;;  %v349_v31 = vadd.f32 %v348_v4, %v347_v57  ;;  %v247_v44 = vadd.f32 %v246_v41, %v245_v58  ;;  %v253_v15 = vadd.f32 %v252_v6, %v251_v30 }
  0x9a   :  { %v352_v16 = vrot.slane %v351_v26, 2  ;;  %v358_v35 = vrot.slane %v357_v42, 2  ;;  %v256_v18 = vrot.slane %v255_v13, 2  ;;  %v262_v21 = vrot.slane %v261_v14, 2 }
  0x9b   :  { %v433_v36 = vpack.c.bf16 %v343_v43, %v343_v43  ;;  %v434_v19 = vpack.c.bf16 %v349_v31, %v349_v31  ;;  %v417_v20 = vpack.c.bf16 %v247_v44, %v247_v44  ;;  %v418_v39 = vpack.c.bf16 %v253_v15, %v253_v15  ;;  %v171_v44 = vpop.permute.xlu1 %170 }
  0x9c   :  { %v353_v24 = vadd.f32 %v352_v16, %v351_v26  ;;  %v359_v49 = vadd.f32 %v358_v35, %v357_v42  ;;  %v257_v50 = vadd.f32 %v256_v18, %v255_v13  ;;  %v263_v9 = vadd.f32 %v262_v21, %v261_v14 }
  0x9d   :  { %v553_v29 = vsel %vm552_vm0, %v522_v27, %v520_v10  ;;  %v1819_v55 = vsel %vm552_vm0, %v523_v28, %v521_v17  ;;  %v540_v56 = vunpack.c.l.b16 %v433_v36  ;;  %v1821_v11 = vunpack.c.l.b16 %v434_v19  ;;  %v115_v36 = vpop.permute.xlu0 %114 }
  0x9e   :  { %v354_v0 = vrot.slane %v353_v24, 1  ;;  %v360_v57 = vrot.slane %v359_v49, 1  ;;  %v258_v58 = vrot.slane %v257_v50, 1  ;;  %v264_v30 = vrot.slane %v263_v9, 1 }
  0x9f   :  { %v524_v34 = vunpack.c.l.b16 %v417_v20  ;;  %v1823_v1 = vunpack.c.l.b16 %v418_v39  ;;  %v210_v2 = vmul.f32 %v164_v12, %v64_v45  ;;  %v211_v10 = vmul.f32 %v164_v12, %v65_v46 }
  0xa0   :  { %v355_v27 = vadd.f32 %v354_v0, %v353_v24  ;;  %v361_v17 = vadd.f32 %v360_v57, %v359_v49  ;;  %v259_v28 = vadd.f32 %v258_v58, %v257_v50  ;;  %v265_v3 = vadd.f32 %v264_v30, %v263_v9 }
  0xa1   :  { %v362_v4 = vrot.slane %v210_v2, 4  ;;  %v368_v41 = vrot.slane %v211_v10, 4  ;;  %v194_v6 = vmul.f32 %v108_v33, %v48_v51  ;;  %v195_v26 = vmul.f32 %v108_v33, %v49_v52 }
  0xa2   :  { %v435_v42 = vpack.c.bf16 %v355_v27, %v355_v27  ;;  %v436_v13 = vpack.c.bf16 %v361_v17, %v361_v17  ;;  %v419_v14 = vpack.c.bf16 %v259_v28, %v259_v28  ;;  %v420_v43 = vpack.c.bf16 %v265_v3, %v265_v3 }
  0xa3   :  { %v363_v45 = vadd.f32 %v362_v4, %v210_v2  ;;  %v369_v31 = vadd.f32 %v368_v41, %v211_v10  ;;  %v266_v32 = vrot.slane %v194_v6, 4  ;;  %v272_v46 = vrot.slane %v195_v26, 4 }
  0xa4   :  { %v574_v15 = vsel %vm554_vm1, %v540_v56, %v1804_v25  ;;  %v555_v16 = vsel %vm554_vm1, %v524_v34, %v553_v29  ;;  %v542_v35 = vunpack.c.l.b16 %v435_v42  ;;  %v1836_v51 = vunpack.c.l.b16 %v436_v13 }
  0xa5   :  { %v364_v37 = vrot.slane %v363_v45, 2  ;;  %v370_v52 = vrot.slane %v369_v31, 2  ;;  %v267_v18 = vadd.f32 %v266_v32, %v194_v6  ;;  %v273_v21 = vadd.f32 %v272_v46, %v195_v26 }
  0xa6   :  { %v526_v19 = vunpack.c.l.b16 %v419_v14  ;;  %v1838_v20 = vunpack.c.l.b16 %v420_v43  ;;  %v212_v39 = vmul.f32 %v171_v44, %v66_v53  ;;  %v213_v25 = vmul.f32 %v171_v44, %v67_v54  ;;  %v178_v43 = vpop.permute.xlu1 %177 }
  0xa7   :  { %v365_v24 = vadd.f32 %v364_v37, %v363_v45  ;;  %v371_v49 = vadd.f32 %v370_v52, %v369_v31  ;;  %v268_v50 = vrot.slane %v267_v18, 2  ;;  %v274_v9 = vrot.slane %v273_v21, 2 }
  0xa8   :  { %v374_v12 = vrot.slane %v212_v39, 4  ;;  %v380_v29 = vrot.slane %v213_v25, 4  ;;  %v196_v56 = vmul.f32 %v115_v36, %v50_v61  ;;  %v197_v0 = vmul.f32 %v115_v36, %v51_v62 }
  0xa9   :  { %v366_v57 = vrot.slane %v365_v24, 1  ;;  %v372_v58 = vrot.slane %v371_v49, 1  ;;  %v269_v30 = vadd.f32 %v268_v50, %v267_v18  ;;  %v275_v33 = vadd.f32 %v274_v9, %v273_v21  ;;  %v122_v21 = vpop.permute.xlu0 %121 }
  0xaa   :  { %v375_v53 = vadd.f32 %v374_v12, %v212_v39  ;;  %v381_v34 = vadd.f32 %v380_v29, %v213_v25  ;;  %v278_v38 = vrot.slane %v196_v56, 4  ;;  %v284_v54 = vrot.slane %v197_v0, 4 }
  0xab   :  { %v367_v2 = vadd.f32 %v366_v57, %v365_v24  ;;  %v373_v10 = vadd.f32 %v372_v58, %v371_v49  ;;  %v270_v27 = vrot.slane %v269_v30, 1  ;;  %v276_v17 = vrot.slane %v275_v33, 1 }
  0xac   :  { %v376_v28 = vrot.slane %v375_v53, 2  ;;  %v382_v3 = vrot.slane %v381_v34, 2  ;;  %v279_v4 = vadd.f32 %v278_v38, %v196_v56  ;;  %v285_v41 = vadd.f32 %v284_v54, %v197_v0  ;;  %v185_v38 = vpop.permute.xlu1 %184 }
  0xad   :  { %v437_v61 = vpack.c.bf16 %v367_v2, %v367_v2  ;;  %v438_v6 = vpack.c.bf16 %v373_v10, %v373_v10  ;;  %v271_v47 = vadd.f32 %v270_v27, %v269_v30  ;;  %v277_v62 = vadd.f32 %v276_v17, %v275_v33 }
  0xae   :  { %v377_v26 = vadd.f32 %v376_v28, %v375_v53  ;;  %v383_v42 = vadd.f32 %v382_v3, %v381_v34  ;;  %v280_v13 = vrot.slane %v279_v4, 2  ;;  %v286_v14 = vrot.slane %v285_v41, 2 }
  0xaf   :  { %v1849_v45 = vsel %vm556_vm2, %v542_v35, %v574_v15  ;;  %v1852_v31 = vsel %vm556_vm2, %v526_v19, %v555_v16  ;;  %v1854_v32 = vunpack.c.l.b16 %v437_v61  ;;  %v1856_v46 = vunpack.c.l.b16 %v438_v6 }
  0xb0   :  { %v378_v44 = vrot.slane %v377_v26, 1  ;;  %v384_v37 = vrot.slane %v383_v42, 1  ;;  %v281_v52 = vadd.f32 %v280_v13, %v279_v4  ;;  %v287_v18 = vadd.f32 %v286_v14, %v285_v41  ;;  %v129_v4 = vpop.permute.xlu0 %128 }
  0xb1   :  { %v421_v36 = vpack.c.bf16 %v271_v47, %v271_v47  ;;  %v422_v39 = vpack.c.bf16 %v277_v62, %v277_v62  ;;  %v214_v25 = vmul.f32 %v178_v43, %v68_v63  ;;  %v2026_v15 = vunpack.c.h.bf16 %v1764_v48 }
  0xb2   :  { %v379_v24 = vadd.f32 %v378_v44, %v377_v26  ;;  %v385_v16 = vadd.f32 %v384_v37, %v383_v42  ;;  %v282_v19 = vrot.slane %v281_v52, 1  ;;  %v288_v49 = vrot.slane %v287_v18, 1 }
  0xb3   :  { %v215_v35 = vmul.f32 %v178_v43, %v2026_v15  ;;  %v386_v50 = vrot.slane %v214_v25, 4  ;;  %v2027_v12 = vunpack.c.l.bf16 %v1773_v59  ;;  %v2028_v56 = vunpack.c.h.bf16 %v1773_v59 }
  0xb4   :  { %v439_v57 = vpack.c.bf16 %v379_v24, %v379_v24  ;;  %v440_v58 = vpack.c.bf16 %v385_v16, %v385_v16  ;;  %v283_v30 = vadd.f32 %v282_v19, %v281_v52  ;;  %v289_v33 = vadd.f32 %v288_v49, %v287_v18 }
  0xb5   :  { %v392_v9 = vrot.slane %v215_v35, 4  ;;  %v198_v29 = vmul.f32 %v122_v21, %v2027_v12  ;;  %v199_v0 = vmul.f32 %v122_v21, %v2028_v56  ;;  %v387_v63 = vadd.f32 %v386_v50, %v214_v25 }
  0xb6   :  { %v1866_v54 = vunpack.c.l.b16 %v421_v36  ;;  %v1868_v2 = vunpack.c.l.b16 %v422_v39  ;;  %v1870_v10 = vunpack.c.l.b16 %v439_v57  ;;  %v1872_v27 = vunpack.c.l.b16 %v440_v58 }
  0xb7   :  { %v393_v53 = vadd.f32 %v392_v9, %v215_v35  ;;  %v290_v48 = vrot.slane %v198_v29, 4  ;;  %v296_v34 = vrot.slane %v199_v0, 4  ;;  %v388_v17 = vrot.slane %v387_v63, 2 }
  0xb8   :  { %v423_v41 = vpack.c.bf16 %v283_v30, %v283_v30  ;;  %v424_v61 = vpack.c.bf16 %v289_v33, %v289_v33  ;;  %v2029_v6 = vunpack.c.l.bf16 %v1778_v60  ;;  %v2030_v62 = vunpack.c.h.bf16 %v1778_v60 }
  0xb9   :  { %v394_v59 = vrot.slane %v393_v53, 2  ;;  %v291_v28 = vadd.f32 %v290_v48, %v198_v29  ;;  %v297_v3 = vadd.f32 %v296_v34, %v199_v0  ;;  %v389_v42 = vadd.f32 %v388_v17, %v387_v63 }
  0xba   :  { %v216_v47 = vmul.f32 %v185_v38, %v2029_v6  ;;  %v217_v26 = vmul.f32 %v185_v38, %v2030_v62  ;;  %v200_v52 = vmul.f32 %v129_v4, %v54_v22  ;;  %v201_v18 = vmul.f32 %v129_v4, %v55_v23 }
  0xbb   :  { %v395_v13 = vadd.f32 %v394_v59, %v393_v53  ;;  %v292_v14 = vrot.slane %v291_v28, 2  ;;  %v298_v43 = vrot.slane %v297_v3, 2  ;;  %v390_v21 = vrot.slane %v389_v42, 1 }
  0xbc   :  { %v398_v44 = vrot.slane %v216_v47, 4  ;;  %v404_v37 = vrot.slane %v217_v26, 4  ;;  %v302_v60 = vrot.slane %v200_v52, 4  ;;  %v308_v24 = vrot.slane %v201_v18, 4 }
  0xbd   :  { %v396_v36 = vrot.slane %v395_v13, 1  ;;  %v293_v39 = vadd.f32 %v292_v14, %v291_v28  ;;  %v299_v25 = vadd.f32 %v298_v43, %v297_v3  ;;  %v391_v16 = vadd.f32 %v390_v21, %v389_v42 }
  0xbe   :  { %v399_v15 = vadd.f32 %v398_v44, %v216_v47  ;;  %v405_v35 = vadd.f32 %v404_v37, %v217_v26  ;;  %v303_v29 = vadd.f32 %v302_v60, %v200_v52  ;;  %v309_v22 = vadd.f32 %v308_v24, %v201_v18 }
  0xbf   :  { %v397_v19 = vadd.f32 %v396_v36, %v395_v13  ;;  %v294_v49 = vrot.slane %v293_v39, 1  ;;  %v300_v50 = vrot.slane %v299_v25, 1  ;;  %v441_v5 = vpack.c.bf16 %v391_v16, %v391_v16 }
  0xc0   :  { %v400_v9 = vrot.slane %v399_v15, 2  ;;  %v406_v12 = vrot.slane %v405_v35, 2  ;;  %v304_v30 = vrot.slane %v303_v29, 2  ;;  %v310_v33 = vrot.slane %v309_v22, 2 }
  0xc1   :  { %v295_v23 = vadd.f32 %v294_v49, %v293_v39  ;;  %v301_v56 = vadd.f32 %v300_v50, %v299_v25  ;;  %v442_v0 = vpack.c.bf16 %v397_v19, %v397_v19  ;;  %v530_v63 = vunpack.c.l.b16 %v423_v41  ;;  %v1414_v49 = vld [vmem:[%s2021_s3 + $0xd4] ss:$8 sps:$4 sm:$0xff]   ;;  %v1416_v50 = vld [vmem:[%s2021_s3 + $0xd0] ss:$8 sps:$4 sm:$0xff]  }
  0xc2   :  { %v401_v57 = vadd.f32 %v400_v9, %v399_v15  ;;  %v407_v58 = vadd.f32 %v406_v12, %v405_v35  ;;  %v531_v53 = vunpack.c.l.b16 %v424_v61  ;;  %v305_v59 = vadd.f32 %v304_v30, %v303_v29  ;;  %1023 = vmatprep.subr.bf16.mxu1 %v1414_v49  ;;  %v1417_v9 = vld [vmem:[%s2021_s3 + $0xc4] ss:$8 sps:$4 sm:$0xff]   ;;  %v1419_v12 = vld [vmem:[%s2021_s3 + $0xc0] ss:$8 sps:$4 sm:$0xff]   ;;  %v1420_v29 = vld [vmem:[%s2021_s3 + $0xb4] ss:$8 sps:$4 sm:$0xff]  }
  0xc3   :  { %v425_v48 = vpack.c.bf16 %v295_v23, %v295_v23  ;;  %v426_v34 = vpack.c.bf16 %v301_v56, %v301_v56  ;;  %v311_v28 = vadd.f32 %v310_v33, %v309_v22  ;;  %v548_v3 = vunpack.c.l.b16 %v441_v5  ;;  %1024 = vmatpush2.bf16.msra.mxu1 %v1416_v50  ;;  %v1422_v22 = vld [vmem:[%s2021_s3 + $0xb0] ss:$8 sps:$4 sm:$0xff]   ;;  %v1423_v5 = vld [vmem:[%s2021_s3 + $0xa4] ss:$8 sps:$4 sm:$0xff]   ;;  %v1425_v23 = vld [vmem:[%s2021_s3 + $0xa0] ss:$8 sps:$4 sm:$0xff]  }
  0xc4   :  { %v402_v38 = vrot.slane %v401_v57, 1  ;;  %v408_v17 = vrot.slane %v407_v58, 1  ;;  %v549_v4 = vunpack.c.l.b16 %v442_v0  ;;  %v567_v6 = vsel %vm554_vm1, %v1823_v1, %v1819_v55  ;;  %1025 = vmatprep.subr.bf16.mxu1 %v1417_v9  ;;  %v1426_v56 = vld [vmem:[%s2021_s3 + $0x94] ss:$8 sps:$4 sm:$0xff]   ;;  %v1428_v0 = vld [vmem:[%s2021_s3 + $0x90] ss:$8 sps:$4 sm:$0xff]  }
  0xc5   :  { %v581_v47 = vsel %vm554_vm1, %v1821_v11, %v1807_v40  ;;  %v306_v26 = vrot.slane %v305_v59, 1  ;;  %v312_v41 = vrot.slane %v311_v28, 1  ;;  %v532_v42 = vunpack.c.l.b16 %v425_v48  ;;  %v1432_v30 = vld [vmem:[%s2023_s4 + $0x78] sm:$0xff]   ;;  %v1436_v48 = vld [vmem:[%s2023_s4 + $0x68] sm:$0xff]  }
  0xc6   :  { %v403_v62 = vadd.f32 %v402_v38, %v401_v57  ;;  %v409_v61 = vadd.f32 %v408_v17, %v407_v58  ;;  %v533_v13 = vunpack.c.l.b16 %v426_v34  ;;  %v568_v14 = vsel %vm556_vm2, %v1838_v20, %v567_v6  ;;  %v1429_v57 = vld [vmem:[%s2021_s3 + $0x84] ss:$8 sps:$4 sm:$0xff]   ;;  %v1431_v58 = vld [vmem:[%s2021_s3 + $0x80] ss:$8 sps:$4 sm:$0xff]   ;;  %v1433_v33 = vld [vmem:[%s2023_s4 + $0x38] sm:$0xff]   ;;  %1314 = vmatprep.subr.bf16.mxu0 %v1432_v30 }
  0xc7   :  { %v582_v43 = vsel %vm556_vm2, %v1836_v51, %v581_v47  ;;  %v307_v37 = vadd.f32 %v306_v26, %v305_v59  ;;  %v313_v52 = vadd.f32 %v312_v41, %v311_v28  ;;  %v569_v1 = vsel %vm558_vm3, %v1868_v2, %v568_v14  ;;  %1026 = vmatpush2.bf16.msra.mxu1 %v1419_v12  ;;  %v1437_v34 = vld [vmem:[%s2023_s4 + $0x28] sm:$0xff]   ;;  %v1438_v38 = vld [vmem:[%s2023_s4 + $0x60] sm:$0xff]   ;;  %v1440_v59 = vld [vmem:[%s2023_s4 + $0x58] sm:$0xff]  }
  0xc8   :  { %v443_v44 = vpack.c.bf16 %v403_v62, %v403_v62  ;;  %v444_v55 = vpack.c.bf16 %v409_v61, %v409_v61  ;;  %v583_v40 = vsel %vm558_vm3, %v1856_v46, %v582_v43  ;;  %v559_v11 = vsel %vm558_vm3, %v1866_v54, %v1852_v31  ;;  %1027 = vmatprep.subr.bf16.mxu1 %v1420_v29  ;;  %v1439_v17 = vld [vmem:[%s2023_s4 + $0x20] sm:$0xff]   ;;  %v1441_v28 = vld [vmem:[%s2023_s4 + $0x18] sm:$0xff]  }
  0xc9   :  { %v576_v20 = vsel %vm558_vm3, %v1854_v32, %v1849_v45  ;;  %v427_v51 = vpack.c.bf16 %v307_v37, %v307_v37  ;;  %v428_v21 = vpack.c.bf16 %v313_v52, %v313_v52  ;;  %v570_v39 = vsel %vm560_vm4, %v531_v53, %v569_v1  ;;  %v1435_v53 = vld [vmem:[%s2023_s4 + $0x30] sm:$0xff]  }
  0xca   :  { %v550_v18 = vunpack.c.l.b16 %v443_v44  ;;  %v551_v36 = vunpack.c.l.b16 %v444_v55  ;;  %v584_v2 = vsel %vm560_vm4, %v1872_v27, %v583_v40  ;;  %v561_v25 = vsel %vm560_vm4, %v530_v63, %v559_v11  ;;  %v1434_v63 = vld [vmem:[%s2023_s4 + $0x70] sm:$0xff]  }
  0xcb   :  { %v577_v46 = vsel %vm560_vm4, %v1870_v10, %v576_v20  ;;  %v534_v15 = vunpack.c.l.b16 %v427_v51  ;;  %v535_v31 = vunpack.c.l.b16 %v428_v21  ;;  %v585_v54 = vsel %vm562_vm5, %v549_v4, %v584_v2  ;;  %1028 = vmatpush2.bf16.msra.mxu1 %v1422_v22  ;;  %v1442_v40 = vld [vmem:[%s2023_s4 + $0x50] sm:$0xff]   ;;  %v1444_v20 = vld [vmem:[%s2023_s4 + $0x48] sm:$0xff]   ;;  %v1446_v51 = vld [vmem:[%s2023_s4 + $0x40] sm:$0xff]  }
  0xcc   :  { %v578_v45 = vsel %vm562_vm5, %v548_v3, %v577_v46  ;;  %v571_v32 = vsel %vm562_vm5, %v533_v13, %v570_v39  ;;  %v586_v35 = vsel %vm564_vm6, %v551_v36, %v585_v54  ;;  %v563_v60 = vsel %vm562_vm5, %v532_v42, %v561_v25  ;;  %1029 = vmatprep.subr.bf16.mxu1 %v1423_v5  ;;  %v410_v3 = vld [vmem:[%s2024_s5] sm:$0x3]  ;;  %v1443_v11 = vld [vmem:[%s2023_s4 + $0x10] sm:$0xff]   ;;  %v411_v36 = vld [vmem:[%s2024_s5 + $0x2] sm:$0x3] }
  0xcd   :  { %v579_v24 = vsel %vm564_vm6, %v550_v18, %v578_v45  ;;  %v572_v27 = vsel %vm564_vm6, %v535_v31, %v571_v32  ;;  %v565_v16 = vsel %vm564_vm6, %v534_v15, %v563_v60  ;;  %v485_v4 = vrot.slane %v410_v3, %v1516_v8  ;;  %v1445_v18 = vld [vmem:[%s2023_s4 + $0x8] sm:$0xff]   ;;  %v1447_v21 = vld [vmem:[%s2023_s4] sm:$0xff]  }
  0xce   :  { %v588_v19 = vpack.c.b16 %v586_v35, %v572_v27  ;;  %v587_v10 = vpack.c.b16 %v579_v24, %v565_v16  ;;  %v481_v47 = vrot.slane %v410_v3, %v1513_v7  ;;  %v840_v2 = vrot.slane %v411_v36, %v1516_v8 }
  0xcf   :  { %1030 = vmatpush2.bf16.msra.mxu1 %v1425_v23  ;;  %v836_v25 = vrot.slane %v411_v36, %v1513_v7  ;;  %v1297_v7 = vld [vmem:[%s2024_s5 + $0x4] ss:$0 sm:$0xff] }
  0xd0   :  { %783 = vmatprep.mubr.bf16.mxu0 %v588_v19  ;;  %1031 = vmatprep.subr.bf16.mxu1 %v1426_v56 }
  0xd1   :  { %784 = vmatmul.mubr.bf16.vlgmr.msra.gmra.mxu0 %v587_v10 }
  0xd2   :  { %1315 = vmatpush3.bf16.msra.mxu0 %v1433_v33 }
  0xd3   :  { %1032 = vmatpush2.bf16.msra.mxu1 %v1428_v0  ;;  %1316 = vmatprep.subr.bf16.mxu0 %v1434_v63 }
  0xd4   :  { %1033 = vmatprep.subr.bf16.mxu1 %v1429_v57 }
  0xd6   :  { %1317 = vmatpush3.bf16.msra.mxu0 %v1435_v53 }
  0xd7   :  { %1034 = vmatpush2.bf16.msra.mxu1 %v1431_v58  ;;  %1318 = vmatprep.subr.bf16.mxu0 %v1436_v48 }
  0xda   :  { %1319 = vmatpush3.bf16.msra.mxu0 %v1437_v34 }
  0xdb   :  { %1320 = vmatprep.subr.bf16.mxu0 %v1438_v38 }
  0xde   :  { %1321 = vmatpush3.bf16.msra.mxu0 %v1439_v17 }
  0xdf   :  { %1322 = vmatprep.subr.bf16.mxu0 %v1440_v59 }
  0xe2   :  { %1323 = vmatpush3.bf16.msra.mxu0 %v1441_v28 }
  0xe3   :  { %1324 = vmatprep.subr.bf16.mxu0 %v1442_v40 }
  0xe6   :  { %1325 = vmatpush3.bf16.msra.mxu0 %v1443_v11 }
  0xe7   :  { %1326 = vmatprep.subr.bf16.mxu0 %v1444_v20 }
  0xea   :  { %1327 = vmatpush3.bf16.msra.mxu0 %v1445_v18 }
  0xeb   :  { %1328 = vmatprep.subr.bf16.mxu0 %v1446_v51 }
  0xee   :  { %1329 = vmatpush3.bf16.msra.mxu0 %v1447_v21 }
 0x191   :  { %v785_v6 = vpop.f32.mrf.mxu0 }
 0x192   :  { %v786_v42 = vadd.f32 %v785_v6, %v481_v47 }
 0x193   :  { %v787_v62 = vpop.f32.mrf.mxu0 }
 0x194   :  { %v788_v26 = vadd.f32 %v787_v62, %v485_v4 }
 0x195   :  { %v789_v41 = vpop.f32.mrf.mxu0 }
 0x196   :  { %v790_v61 = vadd.f32 %v789_v41, %v481_v47  ;;  %1448 = vtanh.f32 %v788_v26 }
 0x197   :  { %v791_v13 = vpop.f32.mrf.mxu0 }
 0x198   :  { %v792_v14 = vadd.f32 %v791_v13, %v485_v4  ;;  %1450 = vtanh.f32 %v790_v61 }
 0x19a   :  { %1452 = vtanh.f32 %v792_v14 }
 0x19b   :  { %1454 = vtanh.f32 %v786_v42 }
 0x1a3   :  { %v1449_v43 = vpop.eup %1448 }
 0x1a5   :  { %v1451_v44 = vpop.eup %1450 }
 0x1a7   :  { %v1453_v37 = vpop.eup %1452 }
 0x1a8   :  { %v1455_v52 = vpop.eup %1454  ;;  %v799_v55 = vpack.c.bf16 %v1453_v37, %v1449_v43 }
 0x1a9   :  { %v798_v1 = vpack.c.bf16 %v1451_v44, %v1455_v52 }
 0x1aa   :  { %1035 = vmatprep.mubr.bf16.mxu1 %v799_v55 }
 0x1ab   :  { %1036 = vmatmul.mubr.bf16.vlgmr.msra.gmra.mxu1 %v798_v1 }
 0x26b   :  { %v1037_v39 = vpop.f32.mrf.mxu1 }
 0x26c   :  { %v1038_v45 = vadd.f32 %v1037_v39, %v836_v25 }
 0x26d   :  { %v1039_v46 = vpop.f32.mrf.mxu1 }
 0x26e   :  { %v1040_v31 = vadd.f32 %v1039_v46, %v840_v2  ;;  %v1046_v16 = vmax.f32 %v1038_v45, 0.0 }
 0x26f   :  { %v1041_v15 = vpop.f32.mrf.mxu1 }
 0x270   :  { %v1042_v54 = vadd.f32 %v1041_v15, %v836_v25  ;;  %v1047_v24 = vmax.f32 %v1040_v31, 0.0 }
 0x271   :  { %v1043_v32 = vpop.f32.mrf.mxu1 }
 0x272   :  { %v1044_v35 = vadd.f32 %v1043_v32, %v840_v2  ;;  %v1048_v60 = vmax.f32 %v1042_v54, 0.0 }
 0x274   :  { %v1049_v27 = vmax.f32 %v1044_v35, 0.0  ;;  %v1050_v10 = vpack.c.bf16 %v1048_v60, %v1046_v16 }
 0x276   :  { %v1051_v19 = vpack.c.bf16 %v1049_v27, %v1047_v24 }
 0x278   :  { %1218 = vmatprep.mubr.bf16.mxu0 %v1051_v19 }
 0x279   :  { %1219 = vmatmul.mubr.bf16.vlgmr.msra.gmra.mxu0 %v1050_v10 }
 0x339   :  { %v1330_v49 = vpop.f32.mrf.mxu0 }
 0x33b   :  { %v1331_v8 = vpop.f32.mrf.mxu0 }
 0x33c   :  { %v1332_v50 = vadd.f32 %v1331_v8, %v1330_v49 }
 0x33d   :  { %v1333_v9 = vpop.f32.mrf.mxu0 }
 0x33e   :  { %v1221_v12 = vadd.f32 %v1332_v50, %v1297_v7 }
 0x33f   :  { %v1334_v29 = vpop.f32.mrf.mxu0 }
 0x340   :  { %1227 = vst [vmem:[%s2025_s6] sm:$0xff] %v1221_v12  ;;  %v1335_v22 = vadd.f32 %v1334_v29, %v1333_v9 }
 0x342   :  { %v1224_v5 = vadd.f32 %v1335_v22, %v1297_v7 }
 0x344   :  { %1228 = vst [vmem:[%s2025_s6 + $0x8] sm:$0xff] %v1224_v5 }

</bundles_post_ra>
